<compile_context>
chip_gen: v7x
topology: tpu7x:2x2x1
jax: 0.10.0
libtpu: 0.0.40
codegen_flags: <defaults>
</compile_context>

<pallas_src>
import jax
import jax.numpy as jnp
from jax.experimental import pallas as pl
from jax.experimental.pallas import tpu as pltpu

SUBLANE = 8  # f32 sublane height


def _round_up(n, m):
    return ((n + m - 1) // m) * m


def _fused_linear_kernel(x_ref, w_ref, b_ref, o_ref):
    """out = x @ W_eff + b_eff on one (tb, I) batch tile.

    x_ref: (tb, I)   w_ref: (I, O)   b_ref: (1, O)   o_ref: (tb, O)
    """
    o_ref[...] = (
        jnp.dot(x_ref[...], w_ref[...], preferred_element_type=jnp.float32)
        + b_ref[...]
    ).astype(o_ref.dtype)


def prepare_params(params):
    """One-time layout/algebra prep (hoisted out of the forward hot path).

    Since fc1 -> fc2 has no activation in between:
        out = (x @ W1.T + b1) @ W2.T + b2
            = x @ (W2 @ W1).T + (b1 @ W2.T + b2)
    so we precompute the fused (I, O) weight and (1, O) bias once.
    """
    w1, b1 = params["fc1"]            # (H, I), (H,)
    w2, b2 = params["fc2"]            # (O, H), (O,)
    I = w1.shape[1]
    H = w1.shape[0]
    O = w2.shape[0]

    w_eff = jnp.asarray(w2 @ w1, jnp.float32).T          # (I, O)
    b_eff = jnp.asarray(b1 @ w2.T + b2, jnp.float32).reshape(1, O)

    return {"w_eff": w_eff, "b_eff": b_eff, "dims": (I, H, O)}


def nn_2layers_xavier_forward(x, prepared, tile_b=4096):
    """Pallas forward. `prepared` comes from `prepare_params` (called once)."""
    w_eff = prepared["w_eff"]          # (I, O)
    b_eff = prepared["b_eff"]          # (1, O)
    I, O = w_eff.shape

    x = jnp.asarray(x, jnp.float32)
    B = x.shape[0]

    # Batch tile: multiple of 8 sublanes; aim for >= 2 grid steps so the
    # "parallel" batch axis can shard across v7x's 2 TensorCores (harmless on
    # single-TC v5e/v6e); cap at tile_b for VMEM / pipelining granularity.
    n_steps = max(2, pl.cdiv(B, tile_b))
    tb = max(SUBLANE, _round_up(pl.cdiv(B, n_steps), SUBLANE))
    grid = (pl.cdiv(B, tb),)

    out = pl.pallas_call(
        _fused_linear_kernel,
        out_shape=jax.ShapeDtypeStruct((B, O), jnp.float32),
        grid_spec=pltpu.PrefetchScalarGridSpec(
            num_scalar_prefetch=0,
            grid=grid,
            in_specs=[
                # x tile: last dim == full array dim (22) -> contiguous,
                # un-padded HBM reads; batch dim pipelined/double-buffered.
                pl.BlockSpec((tb, I), lambda i: (i, 0)),
                # Fused weight + bias stay VMEM-resident (constant block 0).
                pl.BlockSpec((I, O), lambda i: (0, 0)),
                pl.BlockSpec((1, O), lambda i: (0, 0)),
            ],
            # Output at real width O: no padded lanes, no post-kernel slice.
            out_specs=pl.BlockSpec((tb, O), lambda i: (i, 0)),
        ),
        compiler_params=pltpu.CompilerParams(
            dimension_semantics=("parallel",)),
    )(x, w_eff, b_eff)

    return out


def init_params(key, input_size, hidden_size, output_size):
    """Matches the PyTorch module: xavier_uniform_ weights, default
    Linear biases U(-1/sqrt(fan_in), 1/sqrt(fan_in)). PyTorch layout."""
    def xavier(k, fan_out, fan_in):
        bound = (6.0 / (fan_in + fan_out)) ** 0.5
        return jax.random.uniform(k, (fan_out, fan_in), jnp.float32,
                                  -bound, bound)

    def default_bias(k, fan_in, fan_out):
        bound = 1.0 / (fan_in ** 0.5)
        return jax.random.uniform(k, (fan_out,), jnp.float32, -bound, bound)

    k1, k2, k3, k4 = jax.random.split(key, 4)
    w1 = xavier(k1, hidden_size, input_size)
    b1 = default_bias(k2, input_size, hidden_size)
    w2 = xavier(k3, output_size, hidden_size)
    b2 = default_bias(k4, hidden_size, output_size)
    return {"fc1": (w1, b1), "fc2": (w2, b2)}


def reference_forward(x, params):
    """Pure-JAX reference of the PyTorch forward (correctness check)."""
    w1, b1 = params["fc1"]
    w2, b2 = params["fc2"]
    out = x @ w1.T + b1
    return out @ w2.T + b2


if __name__ == "__main__":
    # Small shapes consistent with the module: hidden_size = input_size + 10.
    input_size = 22
    hidden_size = input_size + 10   # 32
    output_size = 6
    batch = 8

    key = jax.random.PRNGKey(0)
    k_x, k_p = jax.random.split(key)
    x = jax.random.normal(k_x, (batch, input_size), jnp.float32)
    params = init_params(k_p, input_size, hidden_size, output_size)

    prepared = prepare_params(params)             # one-time fuse + layout prep
    out = nn_2layers_xavier_forward(x, prepared)
    out = jax.block_until_ready(out)

    ref = reference_forward(x, params)
    assert out.shape == (batch, output_size)
    assert jnp.allclose(out, ref, atol=1e-4, rtol=1e-4)
    print("KERNEL_OK")
</pallas_src>

<mosaic_0001>
module attributes {stable_mosaic.version = 11 : i64} {
  func.func @_fused_linear_kernel(%arg0: i32, %arg1: memref<8x22xf32, #tpu.memory_space<vmem>>, %arg2: memref<22x6xf32, #tpu.memory_space<vmem>>, %arg3: memref<1x6xf32, #tpu.memory_space<vmem>>, %arg4: memref<8x6xf32, #tpu.memory_space<vmem>>) attributes {dimension_semantics = [#tpu.dimension_semantics<parallel>], iteration_bounds = array<i64: 1>, scalar_prefetch = 0 : i64, scratch_operands = 0 : i64, tpu.core_type = #tpu.core_type<tc>, window_params = [{transform_indices = @transform_0, window_bounds = array<i64: 8, 22>}, {pipeline_mode = #tpu.pipeline_mode<synchronous>, transform_indices = @transform_1, window_bounds = array<i64: 22, 6>}, {pipeline_mode = #tpu.pipeline_mode<synchronous>, transform_indices = @transform_2, window_bounds = array<i64: 1, 6>}, {transform_indices = @transform_3, window_bounds = array<i64: 8, 6>}]} {
    %c0 = arith.constant 0 : index
    %c0_0 = arith.constant 0 : index
    %0 = vector.load %arg1[%c0, %c0_0] : memref<8x22xf32, #tpu.memory_space<vmem>>, vector<8x22xf32>
    %c0_1 = arith.constant 0 : index
    %c0_2 = arith.constant 0 : index
    %1 = vector.load %arg2[%c0_1, %c0_2] : memref<22x6xf32, #tpu.memory_space<vmem>>, vector<22x6xf32>
    %cst = arith.constant dense<0.000000e+00> : vector<8x6xf32>
    %2 = tpu.matmul %0, %1, %cst {dimension_numbers = #tpu.dot_dimension_numbers<[1], [0], [0], [1], [0, 0, 1, 1], [], []>} : vector<8x22xf32>, vector<22x6xf32>, vector<8x6xf32> -> vector<8x6xf32>
    %c0_3 = arith.constant 0 : index
    %c0_4 = arith.constant 0 : index
    %3 = vector.load %arg3[%c0_3, %c0_4] : memref<1x6xf32, #tpu.memory_space<vmem>>, vector<1x6xf32>
    %4 = vector.broadcast %3 : vector<1x6xf32> to vector<8x6xf32>
    %5 = arith.addf %2, %4 : vector<8x6xf32>
    %c0_5 = arith.constant 0 : index
    %c0_6 = arith.constant 0 : index
    %6 = vector.load %arg4[%c0_5, %c0_6] : memref<8x6xf32, #tpu.memory_space<vmem>>, vector<8x6xf32>
    tpu.vector_store %arg4[%c0_5, %c0_6], %5 {strides = array<i32>} : memref<8x6xf32, #tpu.memory_space<vmem>>, vector<8x6xf32>,
    return
  }
  func.func @transform_0(%arg0: i32) -> (i32, i32) {
    %c0_i32 = arith.constant 0 : i32
    %c0_i32_0 = arith.constant 0 : i32
    return %arg0, %c0_i32 : i32, i32
  }
  func.func @transform_1(%arg0: i32) -> (i32, i32) {
    %c0_i32 = arith.constant 0 : i32
    %c0_i32_0 = arith.constant 0 : i32
    %c0_i32_1 = arith.constant 0 : i32
    return %c0_i32, %c0_i32_0 : i32, i32
  }
  func.func @transform_2(%arg0: i32) -> (i32, i32) {
    %c0_i32 = arith.constant 0 : i32
    %c0_i32_0 = arith.constant 0 : i32
    %c0_i32_1 = arith.constant 0 : i32
    return %c0_i32, %c0_i32_0 : i32, i32
  }
  func.func @transform_3(%arg0: i32) -> (i32, i32) {
    %c0_i32 = arith.constant 0 : i32
    %c0_i32_0 = arith.constant 0 : i32
    return %arg0, %c0_i32 : i32, i32
  }
}

</mosaic_0001>

<bundles_post_ra>
// kernel: tpu_custom_call.1
= control target key start
LH: loop header
LB: loop body
LE: loop exit
PB: predicated region body
PF: predicated region fallthrough
CT: control target
= control target key end

     0   :  { %v167_v2 = vmov 0.0|0.0   ;;  %vm168_vm0 = vmmov 0   ;;  %v169_v4 = vmov 0.0   ;;  %s218_s0 = inlined_call_operand.vmem [shape: f32[8,22], index: 0, kind: input, shape index: {}]   ;;  %s219_s1 = inlined_call_operand.vmem [shape: f32[22,6], index: 1, kind: input, shape index: {}]   ;;  %s220_s2 = inlined_call_operand.vmem [shape: f32[1,6], index: 2, kind: input, shape index: {}]   ;;  %s221_s3 = inlined_call_operand.hbm [shape: f32[8,6], index: 3, kind: output, shape index: {}]  }
   0x1   :  { %v16_v0 = vld [vmem:[%s219_s1] sm:$0xff]  ;;  %v17_v1 = vld [vmem:[%s219_s1 + $0x8] sm:$0xff]  ;;  %136 = vmatprep.subr.bf16.mxu0 %v167_v2  ;;  %133 = vmatprep.mubr.msk.f32.mxu0 %vm168_vm0, %v169_v4 }
   0x2   :  { %v137_v3 = vpack.c.bf16 %v17_v1, %v16_v0 }
   0x3   :  { %8 = vsyncpa [#allocation3], 0  ;;  %v18_v5 = vld [vmem:[%s219_s1 + $0x10] sm:$0x3f]  ;;  %vm30_vm1 = vcmask 1045504   ;;  %v15_v6 = vld [vmem:[%s218_s0] sm:$0xff] }
   0x4   :  { %138 = vmatpush3.bf16.msra.mxu0 %v137_v3  ;;  %vm26_vm2 = vcmask 179200   ;;  %v120_v7 = vld [vmem:[%s220_s2] ss:$0 sm:$0xff]  ;;  %s170_s22 = smov [#allocation2]   ;;  %vm104_vm3 = vcmask 48128  }
   0x5   :  { %131 = vmatprep.subr.mxu0 %v169_v4  ;;  %s112_s23 = sshll.u32 %s170_s22, 4  ;;  %s113_s23 = int_to_ptr.vmem [resolvable:$true] %s112_s23 }
   0x6   :  { %s143_s1 = scalar_lea.vmem %s113_s23, 128  ;;  %p148_p1 = scmp.lt.s32.totalorder %s113_s23, %s113_s23 }
   0x7   :  { %p144_p0 = scmp.ne.s32.totalorder %s113_s23, %s143_s1  ;;  %p149_p2 = scmp.lt.s32.totalorder %s143_s1, %s143_s1 }
   0x8   :  { %132 = vmatpush3.msk.msra.mxu0 %vm30_vm1, %v18_v5 }
   0x9   :  { %134 = vmatmul.mubr.msk.f32.vlgmr.msra.gmra.mrb[0].mxu0 %vm26_vm2, %v15_v6  ;;  %p150_p3 = por %p149_p2, %p148_p1 }
   0xb   :  { %p151_p4 = pnand %p150_p3, %p144_p0 }
  0xdc   :  { %v100_v8 = vpop.f32.mrb[0].mxu0 }
  0xdd   :  { %v101_v9 = vadd.f32 %v120_v7, %v100_v8  ;;  %v135_v10 = vpop.f32.mrb[1].mxu0 }
  0xdf   :  { %105 = vst.msk [vmem:[#allocation2] sm:$0xff] %vm104_vm3, %v101_v9 }
  0xe0   :  { %154 = shalt.err (!%p151_p4)
}
  0xe1   :  { %s155_s25 = scalar_lea.hbm %s221_s3, 128 }
  0xe2   :  { %p156_p5 = scmp.ne.s32.totalorder %s221_s3, %s155_s25  ;;  %p159_p6 = scmp.lt.u32.totalorder %s155_s25, %s221_s3 }
  0xe4   :  { %p161_p7 = pnand %p159_p6, %p156_p5 }
  0xe6   :  { %164 = shalt.err (!%p161_p7)
}
  0xe7   :  { %115 = dma.vmem_to_hbm [thread:$0]  %s113_s23, 128, %s221_s3, [#allocation3]  }
  0xe8   :  { %165 = dma.done.wait [#allocation3], 128  }
  0xe9   :  { %166 = vsyncadd [#allocation3], 4294967168 }
  0xea   :  { %119 = vsyncpa [#allocation3], 1 }

</bundles_post_ra>
